<compile_context>
chip_gen: v7x
topology: tpu7x:2x2x1
jax: 0.10.0
libtpu: 0.0.40
codegen_flags: <defaults>
</compile_context>

<pallas_src>
import jax
import jax.numpy as jnp
from jax.experimental import pallas as pl
from jax.experimental.pallas import tpu as pltpu

LANES = 128      # TPU vreg lane width; padded hidden/action axis inside the slab
SUBLANES = 8     # sublane granularity for slab-row / batch-tile alignment


def _round_up(x, m):
    return ((x + m - 1) // m) * m


def pack_params(w1, b1, w2, b2):
    """Pack (w1, b1, w2, b2) into a single lane-dense f32 slab.

    w1: (IN, H), b1: (1, H) or (H,), w2: (H, A), b2: (1, A) or (A,)
    Slab layout (rows, 128):
      [0 : IN)                     w1, lanes [0:H) real, rest 0
      [IN : IN+1)                  b1, lanes [0:H) real, rest 0
      <pad rows to 8-aligned>
      [w2_start : w2_start+128)    w2 padded to (128, 128) with zeros
      [w2_start+128 : +1)          b2, lanes [A:128) = -1e30 (kills padded logits)
    """
    IN, H = w1.shape
    A = w2.shape[1]
    assert H <= LANES and A <= LANES, "hidden/action sizes > 128 need extra tiling"
    b1 = jnp.asarray(b1, jnp.float32).reshape(1, H)
    b2 = jnp.asarray(b2, jnp.float32).reshape(1, A)

    w2_start = _round_up(IN + 1, SUBLANES)           # 8-aligned -> cheap static slice
    rows = _round_up(w2_start + LANES + 1, SUBLANES)

    slab = jnp.zeros((rows, LANES), jnp.float32)
    slab = slab.at[0:IN, 0:H].set(w1.astype(jnp.float32))
    slab = slab.at[IN:IN + 1, 0:H].set(b1)
    slab = slab.at[w2_start:w2_start + H, 0:A].set(w2.astype(jnp.float32))
    b2_row = jnp.full((1, LANES), -1e30, jnp.float32).at[0, 0:A].set(b2[0])
    slab = slab.at[w2_start + LANES:w2_start + LANES + 1, :].set(b2_row)
    return slab, w2_start, rows


def _make_kernel(num_inputs, num_actions, w2_start):
    """Kernel closed over the static slab layout and the real action count."""

    def kernel(x_ref, p_ref, o_ref):
        # ---- unpack the parameter slab with static (zero-cost) slices ----
        w1 = p_ref[0:num_inputs, :]                               # (IN, 128)
        b1 = p_ref[num_inputs:num_inputs + 1, :]                  # (1, 128)
        w2 = p_ref[w2_start:w2_start + LANES, :]                  # (128, 128)
        b2 = p_ref[w2_start + LANES:w2_start + LANES + 1, :]      # (1, 128)

        # ---- linear1 + ReLU (hidden padded to 128 lanes, pad lanes = 0) ----
        x = x_ref[...]                                            # (TB, IN)
        h = jnp.dot(x, w1, preferred_element_type=jnp.float32) + b1
        h = jnp.maximum(h, 0.0)

        # ---- linear2 (padded action lanes get -1e30 bias) ----
        logits = jnp.dot(h, w2, preferred_element_type=jnp.float32) + b2

        # ---- softmax over the action axis ----
        # Padded lanes: exp(-1e30 - m) == 0 exactly, so summing all 128 lanes
        # equals summing the real `num_actions` lanes. Exact divide so rows
        # sum to 1 to f32 rounding (approx reciprocal failed the check).
        m = jnp.max(logits, axis=-1, keepdims=True)
        e = jnp.exp(logits - m)
        denom = jnp.sum(e, axis=-1, keepdims=True)
        probs = e / denom

        # Compact, lane-subset store: only the real actions go back to HBM.
        o_ref[...] = probs[:, :num_actions].astype(o_ref.dtype)

    return kernel


def policy_forward(state, w1, b1, w2, b2, *, max_tb=2048):
    """state: (B, num_inputs) f32; weights stored pre-transposed as (in, out).
    Returns (B, num_actions) action probabilities (softmax over dim=1)."""
    B, num_inputs = state.shape
    num_actions = w2.shape[1]

    # Row-tile selection:
    #   * small/medium B -> a single grid step (per-step overhead dominates),
    #   * large B -> tb capped at max_tb, preferring an even number of steps
    #     so v7x's two TensorCores can split the "parallel" grid axis.
    tb = min(_round_up(B, SUBLANES), max_tb)
    if B > max_tb:
        steps = pl.cdiv(B, tb)
        if steps > 1 and steps % 2 == 1:
            steps += 1
            tb = _round_up(pl.cdiv(B, steps), SUBLANES)

    # Pad the batch to a multiple of tb instead of blowing up the tile size
    # (the old tb=B fallback was a latent VMEM OOM for large non-divisible B).
    B_pad = _round_up(B, tb)
    if B_pad != B:
        state = jnp.pad(state, ((0, B_pad - B), (0, 0)))

    slab, w2_start, rows = pack_params(w1, b1, w2, b2)
    kernel = _make_kernel(num_inputs, num_actions, w2_start)
    grid = (B_pad // tb,)

    cost = pl.CostEstimate(
        flops=2 * B_pad * num_inputs * LANES + 2 * B_pad * LANES * LANES
        + 6 * B_pad * LANES,
        transcendentals=B_pad * LANES,
        bytes_accessed=state.size * 4 + slab.size * 4 + B_pad * num_actions * 4,
    )

    out = pl.pallas_call(
        kernel,
        out_shape=jax.ShapeDtypeStruct((B_pad, num_actions), jnp.float32),
        grid=grid,
        in_specs=[
            # state tile marches down the batch; feature dim == full array dim.
            pl.BlockSpec((tb, num_inputs), lambda i: (i, 0)),
            # single packed parameter slab, constant block index -> one DMA,
            # kept resident in VMEM across all grid steps.
            pl.BlockSpec((rows, LANES), lambda i: (0, 0)),
        ],
        # Compact output: block last dim == full array last dim (legal even
        # though < 128); avoids the 64x padded writeback + wrapper slice pass.
        out_specs=pl.BlockSpec((tb, num_actions), lambda i: (i, 0)),
        compiler_params=pltpu.CompilerParams(
            dimension_semantics=("parallel",)),
        cost_estimate=cost,
    )(state, slab)

    return out[:B] if B_pad != B else out


def init_params(key, num_inputs, num_actions, hidden_size):
    """Deterministic init mirroring nn.Linear default (U(-1/sqrt(fan_in), +))."""
    k1, k2, k3, k4 = jax.random.split(key, 4)
    bound1 = 1.0 / jnp.sqrt(num_inputs)
    bound2 = 1.0 / jnp.sqrt(hidden_size)
    # Stored already transposed: (in, out)
    w1 = jax.random.uniform(k1, (num_inputs, hidden_size), jnp.float32,
                            -bound1, bound1)
    b1 = jax.random.uniform(k2, (1, hidden_size), jnp.float32, -bound1, bound1)
    w2 = jax.random.uniform(k3, (hidden_size, num_actions), jnp.float32,
                            -bound2, bound2)
    b2 = jax.random.uniform(k4, (1, num_actions), jnp.float32, -bound2, bound2)
    return w1, b1, w2, b2


if __name__ == "__main__":
    # Small CartPole-like shapes: a batch of 8 states, num_inputs=4,
    # hidden=32, num_actions=2 -> single grid step (tb = 8).
    B, num_inputs, hidden_size, num_actions = 8, 4, 32, 2

    key = jax.random.PRNGKey(0)
    k_state, k_params = jax.random.split(key)
    state = jax.random.normal(k_state, (B, num_inputs), jnp.float32)
    w1, b1, w2, b2 = init_params(k_params, num_inputs, num_actions, hidden_size)

    probs = policy_forward(state, w1, b1, w2, b2)
    probs = jax.block_until_ready(probs)

    # Reference check in plain JAX.
    h_ref = jnp.maximum(state @ w1 + b1, 0.0)
    ref = jax.nn.softmax(h_ref @ w2 + b2, axis=1)
    assert probs.shape == (B, num_actions), "bad output shape"
    assert jnp.allclose(probs, ref, atol=1e-4, rtol=1e-4), "mismatch vs reference"
    assert jnp.allclose(jnp.sum(probs, axis=1), 1.0, atol=1e-5), "rows must sum to ~1"

    print("KERNEL_OK")
</pallas_src>

<mosaic_0001>
module attributes {stable_mosaic.version = 11 : i64} {
  func.func @kernel(%arg0: i32, %arg1: memref<8x4xf32, #tpu.memory_space<vmem>>, %arg2: memref<144x128xf32, #tpu.memory_space<vmem>>, %arg3: memref<8x2xf32, #tpu.memory_space<vmem>>) attributes {dimension_semantics = [#tpu.dimension_semantics<parallel>], iteration_bounds = array<i64: 1>, scalar_prefetch = 0 : i64, scratch_operands = 0 : i64, tpu.core_type = #tpu.core_type<tc>, window_params = [{transform_indices = @transform_0, window_bounds = array<i64: 8, 4>}, {pipeline_mode = #tpu.pipeline_mode<synchronous>, transform_indices = @transform_1, window_bounds = array<i64: 144, 128>}, {transform_indices = @transform_2, window_bounds = array<i64: 8, 2>}]} {
    %c0 = arith.constant 0 : index
    %c0_0 = arith.constant 0 : index
    %0 = vector.load %arg2[%c0, %c0_0] : memref<144x128xf32, #tpu.memory_space<vmem>>, vector<4x128xf32>
    %c4 = arith.constant 4 : index
    %c0_1 = arith.constant 0 : index
    %1 = vector.load %arg2[%c4, %c0_1] : memref<144x128xf32, #tpu.memory_space<vmem>>, vector<1x128xf32>
    %c8 = arith.constant 8 : index
    %c0_2 = arith.constant 0 : index
    %2 = vector.load %arg2[%c8, %c0_2] : memref<144x128xf32, #tpu.memory_space<vmem>>, vector<128x128xf32>
    %c136 = arith.constant 136 : index
    %c0_3 = arith.constant 0 : index
    %3 = vector.load %arg2[%c136, %c0_3] : memref<144x128xf32, #tpu.memory_space<vmem>>, vector<1x128xf32>
    %c0_4 = arith.constant 0 : index
    %c0_5 = arith.constant 0 : index
    %4 = vector.load %arg1[%c0_4, %c0_5] : memref<8x4xf32, #tpu.memory_space<vmem>>, vector<8x4xf32>
    %cst = arith.constant dense<0.000000e+00> : vector<8x128xf32>
    %5 = tpu.matmul %4, %0, %cst {dimension_numbers = #tpu.dot_dimension_numbers<[1], [0], [0], [1], [0, 0, 1, 1], [], []>} : vector<8x4xf32>, vector<4x128xf32>, vector<8x128xf32> -> vector<8x128xf32>
    %6 = vector.broadcast %1 : vector<1x128xf32> to vector<8x128xf32>
    %7 = arith.addf %5, %6 : vector<8x128xf32>
    %cst_6 = arith.constant 0.000000e+00 : f32
    %8 = vector.broadcast %cst_6 : f32 to vector<8x128xf32>
    %9 = arith.maximumf %7, %8 : vector<8x128xf32>
    %cst_7 = arith.constant dense<0.000000e+00> : vector<8x128xf32>
    %10 = tpu.matmul %9, %2, %cst_7 {dimension_numbers = #tpu.dot_dimension_numbers<[1], [0], [0], [1], [0, 0, 1, 1], [], []>} : vector<8x128xf32>, vector<128x128xf32>, vector<8x128xf32> -> vector<8x128xf32>
    %11 = vector.broadcast %3 : vector<1x128xf32> to vector<8x128xf32>
    %12 = arith.addf %10, %11 : vector<8x128xf32>
    %cst_8 = arith.constant dense<0xFF800000> : vector<8xf32>
    %13 = vector.multi_reduction <maximumf>, %12, %cst_8 [1] : vector<8x128xf32> to vector<8xf32>
    %14 = vector.shape_cast %13 : vector<8xf32> to vector<8x1xf32>
    %15 = vector.broadcast %14 : vector<8x1xf32> to vector<8x128xf32>
    %16 = arith.subf %12, %15 : vector<8x128xf32>
    %17 = math.exp %16 : vector<8x128xf32>
    %cst_9 = arith.constant dense<0.000000e+00> : vector<8xf32>
    %18 = vector.multi_reduction <add>, %17, %cst_9 [1] : vector<8x128xf32> to vector<8xf32>
    %19 = vector.shape_cast %18 : vector<8xf32> to vector<8x1xf32>
    %20 = vector.broadcast %19 : vector<8x1xf32> to vector<8x128xf32>
    %21 = arith.divf %17, %20 : vector<8x128xf32>
    %22 = vector.extract_strided_slice %21 {offsets = [0, 0], sizes = [8, 2], strides = [1, 1]} : vector<8x128xf32> to vector<8x2xf32>
    %c0_10 = arith.constant 0 : index
    %c0_11 = arith.constant 0 : index
    %23 = vector.load %arg3[%c0_10, %c0_11] : memref<8x2xf32, #tpu.memory_space<vmem>>, vector<8x2xf32>
    tpu.vector_store %arg3[%c0_10, %c0_11], %22 {strides = array<i32>} : memref<8x2xf32, #tpu.memory_space<vmem>>, vector<8x2xf32>,
    return
  }
  func.func @transform_0(%arg0: i32) -> (i32, i32) {
    %c0_i32 = arith.constant 0 : i32
    %c0_i32_0 = arith.constant 0 : i32
    return %arg0, %c0_i32 : i32, i32
  }
  func.func @transform_1(%arg0: i32) -> (i32, i32) {
    %c0_i32 = arith.constant 0 : i32
    %c0_i32_0 = arith.constant 0 : i32
    %c0_i32_1 = arith.constant 0 : i32
    return %c0_i32, %c0_i32_0 : i32, i32
  }
  func.func @transform_2(%arg0: i32) -> (i32, i32) {
    %c0_i32 = arith.constant 0 : i32
    %c0_i32_0 = arith.constant 0 : i32
    return %arg0, %c0_i32 : i32, i32
  }
}

</mosaic_0001>

<bundles_post_ra>
// kernel: tpu_custom_call.1
= control target key start
LH: loop header
LB: loop body
LE: loop exit
PB: predicated region body
PF: predicated region fallthrough
CT: control target
= control target key end

     0   :  { %7 = vsyncpa [#allocation3], 0  ;;  %s339_s9 = smov [#allocation2]   ;;  %s378_s0 = inlined_call_operand.vmem [shape: f32[8,4], index: 0, kind: input, shape index: {}]   ;;  %s379_s1 = inlined_call_operand.hbm [shape: f32[144,128], index: 1, kind: input, shape index: {}]   ;;  %s380_s2 = inlined_call_operand.vmem [shape: f32[8,2], index: 2, kind: output, shape index: {}]  }
   0x1   :  { %s15_s10 = sshll.u32 %s339_s9, 4  ;;  %s315_s13 = scalar_lea.hbm %s379_s1, 2304  ;;  %s16_s10 = int_to_ptr.vmem [resolvable:$true] %s15_s10 }
   0x2   :  { %p316_p0 = scmp.ne.s32.totalorder %s379_s1, %s315_s13  ;;  %p319_p1 = scmp.lt.u32.totalorder %s315_s13, %s379_s1 }
   0x4   :  { %p321_p2 = pnand %p319_p1, %p316_p0 }
   0x6   :  { %324 = shalt.err (!%p321_p2)
}
   0x7   :  { %s325_s18 = scalar_lea.vmem %s16_s10, 2304  ;;  %p330_p4 = scmp.lt.s32.totalorder %s16_s10, %s16_s10 }
   0x8   :  { %p326_p3 = scmp.ne.s32.totalorder %s16_s10, %s325_s18  ;;  %p331_p5 = scmp.lt.s32.totalorder %s325_s18, %s325_s18 }
   0xa   :  { %p332_p6 = por %p331_p5, %p330_p4 }
   0xc   :  { %p333_p7 = pnand %p332_p6, %p326_p3 }
   0xe   :  { %336 = shalt.err (!%p333_p7)
}
   0xf   :  { %s340_s19 = smov 128   ;;  %s341_s20 = smov 8  }
  0x10   :  { %21 = dma.hbm_to_vmem [thread:$0]  %s379_s1, 2304, %s16_s10, [#allocation3], %s340_s19, %s340_s19, %s341_s20  }
  0x11   :  { %337 = dma.done.wait [#allocation3], 2304  }
  0x12   :  { %338 = vsyncadd [#allocation3], 4294964992  ;;  %v342_v0 = vmov 0.0   ;;  %vm343_vm0 = vmmov 0   ;;  %v344_v1 = vmov 0.0|0.0   ;;  %vm53_vm1 = vcmask 1043456  }
  0x13   :  { %241 = vmatprep.subr.mxu0 %v342_v0  ;;  %243 = vmatprep.mubr.msk.f32.mxu0 %vm343_vm0, %v342_v0  ;;  %vm49_vm2 = vcmask 31744   ;;  %v25_v2 = vld [vmem:[#allocation2] sm:$0xf]  ;;  %v27_v4 = vld [vmem:[#allocation2 + $0x8] sm:$0xff]  ;;  %v28_v5 = vld [vmem:[#allocation2 + $0x10] sm:$0xff]  ;;  %vm211_vm3 = vcmask 15360  }
  0x14   :  { %281 = vmatprep.subr.bf16.mxu1 %v344_v1  ;;  %278 = vmatprep.mubr.msk.f32.mxu1 %vm343_vm0, %v342_v0  ;;  %v44_v3 = vld [vmem:[%s378_s0] sm:$0xff]  ;;  %v29_v6 = vld [vmem:[#allocation2 + $0x18] sm:$0xff]  ;;  %v282_v8 = vpack.c.bf16 %v28_v5, %v27_v4  ;;  %v31_v10 = vld [vmem:[#allocation2 + $0x28] sm:$0xff] }
  0x15   :  { %242 = vmatpush3.msk.msra.mxu0 %vm53_vm1, %v25_v2  ;;  %v30_v7 = vld [vmem:[#allocation2 + $0x20] sm:$0xff]  ;;  %v32_v11 = vld [vmem:[#allocation2 + $0x30] sm:$0xff]  ;;  %v33_v13 = vld [vmem:[#allocation2 + $0x38] sm:$0xff] }
  0x16   :  { %244 = vmatmul.mubr.msk.f32.vlgmr.msra.gmra.mrb[0].mxu0 %vm49_vm2, %v44_v3  ;;  %283 = vmatpush3.bf16.msra.mxu1 %v282_v8  ;;  %v285_v9 = vpack.c.bf16 %v30_v7, %v29_v6  ;;  %v288_v12 = vpack.c.bf16 %v32_v11, %v31_v10  ;;  %v34_v14 = vld [vmem:[#allocation2 + $0x40] sm:$0xff]  ;;  %v35_v16 = vld [vmem:[#allocation2 + $0x48] sm:$0xff]  ;;  %v36_v17 = vld [vmem:[#allocation2 + $0x50] sm:$0xff] }
  0x17   :  { %284 = vmatprep.subr.bf16.mxu1 %v344_v1  ;;  %v291_v15 = vpack.c.bf16 %v34_v14, %v33_v13  ;;  %v294_v18 = vpack.c.bf16 %v36_v17, %v35_v16  ;;  %v37_v19 = vld [vmem:[#allocation2 + $0x58] sm:$0xff]  ;;  %v38_v20 = vld [vmem:[#allocation2 + $0x60] sm:$0xff]  ;;  %v39_v22 = vld [vmem:[#allocation2 + $0x68] sm:$0xff] }
  0x18   :  { %v297_v21 = vpack.c.bf16 %v38_v20, %v37_v19  ;;  %v40_v23 = vld [vmem:[#allocation2 + $0x70] sm:$0xff]  ;;  %v41_v25 = vld [vmem:[#allocation2 + $0x78] sm:$0xff]  ;;  %v42_v26 = vld [vmem:[#allocation2 + $0x80] sm:$0xff] }
  0x19   :  { %v300_v24 = vpack.c.bf16 %v40_v23, %v39_v22  ;;  %v303_v27 = vpack.c.bf16 %v42_v26, %v41_v25  ;;  %v218_v28 = vld [vmem:[#allocation2 + $0x4] ss:$0 sm:$0xff]  ;;  %v221_v33 = vld [vmem:[#allocation2 + $0x88] ss:$0 sm:$0xff] }
  0x1a   :  { %286 = vmatpush3.bf16.msra.mxu1 %v285_v9 }
  0x1b   :  { %287 = vmatprep.subr.bf16.mxu1 %v344_v1 }
  0x1e   :  { %289 = vmatpush3.bf16.msra.mxu1 %v288_v12 }
  0x1f   :  { %290 = vmatprep.subr.bf16.mxu1 %v344_v1 }
  0x22   :  { %292 = vmatpush3.bf16.msra.mxu1 %v291_v15 }
  0x23   :  { %293 = vmatprep.subr.bf16.mxu1 %v344_v1 }
  0x26   :  { %295 = vmatpush3.bf16.msra.mxu1 %v294_v18 }
  0x27   :  { %296 = vmatprep.subr.bf16.mxu1 %v344_v1 }
  0x2a   :  { %298 = vmatpush3.bf16.msra.mxu1 %v297_v21 }
  0x2b   :  { %299 = vmatprep.subr.bf16.mxu1 %v344_v1 }
  0x2e   :  { %301 = vmatpush3.bf16.msra.mxu1 %v300_v24 }
  0x2f   :  { %302 = vmatprep.subr.bf16.mxu1 %v344_v1 }
  0x32   :  { %304 = vmatpush3.bf16.msra.mxu1 %v303_v27 }
  0xe9   :  { %v123_v29 = vpop.f32.mrb[0].mxu0 }
  0xea   :  { %v124_v30 = vadd.f32 %v218_v28, %v123_v29  ;;  %v245_v31 = vpop.f32.mrb[1].mxu0 }
  0xec   :  { %v127_v32 = vmax.f32 %v124_v30, 0.0 }
  0xee   :  { %279 = vmatmul.mubr.f32.vlgmr.msra.gmra.mrb[0].mxu1 %v127_v32 }
 0x1c1   :  { %v198_v34 = vpop.f32.mrb[0].mxu1 }
 0x1c2   :  { %v199_v35 = vadd.f32 %v221_v33, %v198_v34  ;;  %v280_v36 = vpop.f32.mrb[1].mxu1 }
 0x1c4   :  { %202 = vmax.xlane.f32.xlu0 %v199_v35 }
 0x251   :  { %v203_v37 = vpop.xlane.xlu0 %202 }
 0x252   :  { %v204_v38 = vsub.f32 %v199_v35, %v203_v37 }
 0x254   :  { %v205_v39 = vmul.f32 1.442695, %v204_v38 }
 0x256   :  { %311 = vpow2.f32 %v205_v39 }
 0x260   :  { %v312_v40 = vpop.eup %311 }
 0x261   :  { %207 = vadd.xlane.f32.xlu0 %v312_v40 }
 0x2ee   :  { %v208_v41 = vpop.xlane.xlu0 %207 }
 0x2ef   :  { %313 = vrcp.f32 %v208_v41 }
 0x2f9   :  { %v314_v42 = vpop.eup %313 }
 0x2fa   :  { %v210_v43 = vmul.f32 %v314_v42, %v312_v40 }
 0x2fc   :  { %212 = vst.msk [vmem:[%s380_s2] sm:$0xff] %vm211_vm3, %v210_v43 }
 0x2fd   :  { %217 = vsyncpa [#allocation3], 1 }

</bundles_post_ra>
